<compile_context>
chip_gen: v7x
topology: tpu7x:2x2x1
jax: 0.10.0
libtpu: 0.0.40
codegen_flags: <defaults>
</compile_context>

<pallas_src>
import functools

import jax
import jax.numpy as jnp
from jax.experimental import pallas as pl
from jax.experimental.pallas import tpu as pltpu

TN = 128       # lanes per block row (box index = fast axis)
TS_MAX = 256   # sublane rows per grid step -> up to 32768 boxes per step


def _iou_loss_kernel(*refs, eps, has_weight, elementwise):
    boxes_ref = refs[0]
    if has_weight:
        w_ref, out_ref = refs[1], refs[2]
    else:
        w_ref, out_ref = None, refs[1]

    b = boxes_ref[...].astype(jnp.float32)        # (8, TS, 128)
    px1, py1, px2, py2 = b[0], b[1], b[2], b[3]   # (TS, 128) dense slabs
    tx1, ty1, tx2, ty2 = b[4], b[5], b[6], b[7]

    area_p = (px2 - px1) * (py2 - py1)
    area_t = (tx2 - tx1) * (ty2 - ty1)

    iw = jnp.maximum(jnp.minimum(px2, tx2) - jnp.maximum(px1, tx1), 0.0)
    ih = jnp.maximum(jnp.minimum(py2, ty2) - jnp.maximum(py1, ty1), 0.0)
    overlap = iw * ih
    union = jnp.maximum(area_p + area_t - overlap, eps)   # avoid 0/0 -> NaN

    ious = jnp.maximum(overlap / union, eps)      # .clamp(min=eps)
    loss = 1.0 - ious                             # (TS, 128)
    if has_weight:
        loss = loss * w_ref[...].astype(jnp.float32)

    if elementwise:
        out_ref[...] = loss                       # unmasked dense store
    else:
        # Per-step lane-partial sums; the tiny final reduce happens in XLA.
        out_ref[...] = jnp.sum(loss, axis=0)[None, None, :]


def linear_iou_loss_pallas(pred, target, weight=None, *, eps=1e-6,
                           reduction='mean', avg_factor=None, loss_weight=1.0,
                           reduction_override=None):
    """JAX/Pallas port of LinearIoULoss.forward.  pred/target: (n, 4)."""
    assert reduction_override in (None, 'none', 'mean', 'sum')
    reduction = reduction_override if reduction_override else reduction

    n = pred.shape[0]
    num_blocks = max(1, -(-n // TN))
    ts = min(TS_MAX, num_blocks)          # full-dim block when small, else 256
    num_steps = -(-num_blocks // ts)
    num_blocks_total = num_steps * ts
    n_pad = num_blocks_total * TN

    # Pack pred+target into one (8, blocks, 128) slab in their NATIVE dtype;
    # padded lanes get a degenerate-but-safe pair (iou == 1 -> loss == 0).
    boxes = jnp.concatenate([pred, target], axis=1)          # (n, 8)
    pad_row = jnp.asarray([0, 0, 1, 1, 0, 0, 1, 1], dtype=boxes.dtype)
    if n_pad > n:
        boxes = jnp.concatenate(
            [boxes, jnp.broadcast_to(pad_row, (n_pad - n, 8))], axis=0)
    boxes = boxes.T.reshape(8, num_blocks_total, TN)

    has_weight = weight is not None
    args = [boxes]
    if has_weight:
        w_vec = weight
        if w_vec.ndim > 1:
            # mmdet-style (n, 4) per-coordinate weights -> per-box weight.
            w_vec = w_vec.mean(axis=-1)
        if n_pad > n:
            w_vec = jnp.concatenate(
                [w_vec, jnp.zeros((n_pad - n,), w_vec.dtype)])
        args.append(w_vec.reshape(num_blocks_total, TN))

    elementwise = (reduction == 'none')

    in_specs = [pl.BlockSpec((8, ts, TN), lambda i: (0, i, 0))]
    if has_weight:
        in_specs.append(pl.BlockSpec((ts, TN), lambda i: (i, 0)))

    if elementwise:
        out_shape = jax.ShapeDtypeStruct((num_blocks_total, TN), jnp.float32)
        out_spec = pl.BlockSpec((ts, TN), lambda i: (i, 0))
    else:
        out_shape = jax.ShapeDtypeStruct((num_steps, 1, TN), jnp.float32)
        out_spec = pl.BlockSpec((1, 1, TN), lambda i: (i, 0, 0))

    out = pl.pallas_call(
        functools.partial(_iou_loss_kernel, eps=float(eps),
                          has_weight=has_weight, elementwise=elementwise),
        out_shape=out_shape,
        grid_spec=pltpu.PrefetchScalarGridSpec(
            num_scalar_prefetch=0,
            grid=(num_steps,),
            in_specs=in_specs,
            out_specs=out_spec,
        ),
        compiler_params=pltpu.CompilerParams(
            dimension_semantics=("parallel",)),
    )(*args)

    if elementwise:
        # TODO(synk): torch returns a scalar (pred * weight).sum() when weight
        # has no positive entries; that cannot be merged with an (n,) result.
        return loss_weight * out.reshape(-1)[:n]

    total = jnp.sum(out)                    # tiny (num_steps*128,) reduce
    if reduction == 'mean':
        denom = jnp.float32(n) if avg_factor is None else jnp.float32(avg_factor)
        reduced = total / denom
    elif reduction == 'sum':
        reduced = total
    else:
        raise ValueError(reduction)

    result = loss_weight * reduced

    if has_weight:
        # `if not torch.any(weight > 0): return (pred * weight).sum()`
        w_full = weight.astype(jnp.float32)
        w_b = w_full if w_full.ndim > 1 else w_full[:, None]
        has_pos = jnp.any(w_full > 0)
        fallback = jnp.sum(pred.astype(jnp.float32) * w_b)
        result = jnp.where(has_pos, result, fallback)
    return result


def _reference(pred, target, weight=None, eps=1e-6, reduction='mean',
               avg_factor=None, loss_weight=1.0):
    """Pure-JAX reference for correctness checking."""
    pred = pred.astype(jnp.float32)
    target = target.astype(jnp.float32)
    area_p = (pred[:, 2] - pred[:, 0]) * (pred[:, 3] - pred[:, 1])
    area_t = (target[:, 2] - target[:, 0]) * (target[:, 3] - target[:, 1])
    lt = jnp.maximum(pred[:, :2], target[:, :2])
    rb = jnp.minimum(pred[:, 2:], target[:, 2:])
    wh = jnp.maximum(rb - lt, 0.0)
    overlap = wh[:, 0] * wh[:, 1]
    union = jnp.maximum(area_p + area_t - overlap, eps)
    ious = overlap / union
    loss = 1.0 - jnp.maximum(ious, eps)
    if weight is not None:
        loss = loss * weight
    if reduction == 'mean':
        red = loss.mean() if avg_factor is None else loss.sum() / avg_factor
    elif reduction == 'sum':
        red = loss.sum()
    else:
        red = loss
    return loss_weight * red


if __name__ == "__main__":
    key = jax.random.PRNGKey(0)
    k1, k2, k3, k4, k5 = jax.random.split(key, 5)

    n = 64  # small box count
    # Build valid (x1, y1, x2, y2) boxes deterministically.
    p_xy = jax.random.uniform(k1, (n, 2), jnp.float32) * 10.0
    p_wh = jax.random.uniform(k2, (n, 2), jnp.float32) * 5.0 + 1.0
    pred = jnp.concatenate([p_xy, p_xy + p_wh], axis=1)          # (n, 4)

    t_xy = p_xy + (jax.random.uniform(k3, (n, 2), jnp.float32) - 0.5) * 2.0
    t_wh = p_wh + (jax.random.uniform(k4, (n, 2), jnp.float32) - 0.5) * 1.0
    target = jnp.concatenate([t_xy, t_xy + jnp.maximum(t_wh, 0.5)], axis=1)

    weight = jax.random.uniform(k5, (n,), jnp.float32)

    # default module config: eps=1e-6, reduction='mean', loss_weight=1.0
    out_mean = linear_iou_loss_pallas(pred, target, reduction='mean')
    out_wsum = linear_iou_loss_pallas(pred, target, weight=weight,
                                      reduction='sum')
    out_none = linear_iou_loss_pallas(pred, target, reduction='none')
    out_avgf = linear_iou_loss_pallas(pred, target, weight=weight,
                                      reduction='mean', avg_factor=37.0)

    # Non-multiple-of-128 size to exercise padding + multi-row sublane tiles.
    n2 = 333
    pred2 = jnp.tile(pred, (6, 1))[:n2]
    target2 = jnp.tile(target, (6, 1))[:n2]
    out_sum2 = linear_iou_loss_pallas(pred2, target2, reduction='sum')

    jax.block_until_ready((out_mean, out_wsum, out_none, out_avgf, out_sum2))

    ref_mean = _reference(pred, target, reduction='mean')
    ref_wsum = _reference(pred, target, weight=weight, reduction='sum')
    ref_none = _reference(pred, target, reduction='none')
    ref_avgf = _reference(pred, target, weight=weight, reduction='mean',
                          avg_factor=37.0)
    ref_sum2 = _reference(pred2, target2, reduction='sum')

    assert jnp.allclose(out_mean, ref_mean, atol=1e-5, rtol=1e-5)
    assert jnp.allclose(out_wsum, ref_wsum, atol=1e-4, rtol=1e-4)
    assert jnp.allclose(out_none, ref_none, atol=1e-5, rtol=1e-5)
    assert jnp.allclose(out_avgf, ref_avgf, atol=1e-5, rtol=1e-5)
    assert jnp.allclose(out_sum2, ref_sum2, atol=1e-4, rtol=1e-4)

    print("KERNEL_OK")
</pallas_src>

<mosaic_0001>
module attributes {stable_mosaic.version = 11 : i64} {
  func.func @_iou_loss_kernel(%arg0: i32, %arg1: memref<8x1x128xf32, #tpu.memory_space<vmem>>, %arg2: memref<1x1x128xf32, #tpu.memory_space<vmem>>) attributes {dimension_semantics = [#tpu.dimension_semantics<parallel>], iteration_bounds = array<i64: 1>, scalar_prefetch = 0 : i64, scratch_operands = 0 : i64, tpu.core_type = #tpu.core_type<tc>, window_params = [{transform_indices = @transform_0, window_bounds = array<i64: 8, 1, 128>}, {transform_indices = @transform_1, window_bounds = array<i64: 1, 1, 128>}]} {
    %c0 = arith.constant 0 : index
    %c0_0 = arith.constant 0 : index
    %c0_1 = arith.constant 0 : index
    %0 = vector.load %arg1[%c0, %c0_0, %c0_1] : memref<8x1x128xf32, #tpu.memory_space<vmem>>, vector<8x1x128xf32>
    %1 = vector.extract_strided_slice %0 {offsets = [0, 0, 0], sizes = [1, 1, 128], strides = [1, 1, 1]} : vector<8x1x128xf32> to vector<1x1x128xf32>
    %2 = vector.shape_cast %1 : vector<1x1x128xf32> to vector<1x128xf32>
    %3 = vector.extract_strided_slice %0 {offsets = [1, 0, 0], sizes = [1, 1, 128], strides = [1, 1, 1]} : vector<8x1x128xf32> to vector<1x1x128xf32>
    %4 = vector.shape_cast %3 : vector<1x1x128xf32> to vector<1x128xf32>
    %5 = vector.extract_strided_slice %0 {offsets = [2, 0, 0], sizes = [1, 1, 128], strides = [1, 1, 1]} : vector<8x1x128xf32> to vector<1x1x128xf32>
    %6 = vector.shape_cast %5 : vector<1x1x128xf32> to vector<1x128xf32>
    %7 = vector.extract_strided_slice %0 {offsets = [3, 0, 0], sizes = [1, 1, 128], strides = [1, 1, 1]} : vector<8x1x128xf32> to vector<1x1x128xf32>
    %8 = vector.shape_cast %7 : vector<1x1x128xf32> to vector<1x128xf32>
    %9 = vector.extract_strided_slice %0 {offsets = [4, 0, 0], sizes = [1, 1, 128], strides = [1, 1, 1]} : vector<8x1x128xf32> to vector<1x1x128xf32>
    %10 = vector.shape_cast %9 : vector<1x1x128xf32> to vector<1x128xf32>
    %11 = vector.extract_strided_slice %0 {offsets = [5, 0, 0], sizes = [1, 1, 128], strides = [1, 1, 1]} : vector<8x1x128xf32> to vector<1x1x128xf32>
    %12 = vector.shape_cast %11 : vector<1x1x128xf32> to vector<1x128xf32>
    %13 = vector.extract_strided_slice %0 {offsets = [6, 0, 0], sizes = [1, 1, 128], strides = [1, 1, 1]} : vector<8x1x128xf32> to vector<1x1x128xf32>
    %14 = vector.shape_cast %13 : vector<1x1x128xf32> to vector<1x128xf32>
    %15 = vector.extract_strided_slice %0 {offsets = [7, 0, 0], sizes = [1, 1, 128], strides = [1, 1, 1]} : vector<8x1x128xf32> to vector<1x1x128xf32>
    %16 = vector.shape_cast %15 : vector<1x1x128xf32> to vector<1x128xf32>
    %17 = arith.subf %6, %2 : vector<1x128xf32>
    %18 = arith.subf %8, %4 : vector<1x128xf32>
    %19 = arith.mulf %17, %18 : vector<1x128xf32>
    %20 = arith.subf %14, %10 : vector<1x128xf32>
    %21 = arith.subf %16, %12 : vector<1x128xf32>
    %22 = arith.mulf %20, %21 : vector<1x128xf32>
    %23 = arith.minimumf %6, %14 : vector<1x128xf32>
    %24 = arith.maximumf %2, %10 : vector<1x128xf32>
    %25 = arith.subf %23, %24 : vector<1x128xf32>
    %cst = arith.constant 0.000000e+00 : f32
    %26 = vector.broadcast %cst : f32 to vector<1x128xf32>
    %27 = arith.maximumf %25, %26 : vector<1x128xf32>
    %28 = arith.minimumf %8, %16 : vector<1x128xf32>
    %29 = arith.maximumf %4, %12 : vector<1x128xf32>
    %30 = arith.subf %28, %29 : vector<1x128xf32>
    %cst_2 = arith.constant 0.000000e+00 : f32
    %31 = vector.broadcast %cst_2 : f32 to vector<1x128xf32>
    %32 = arith.maximumf %30, %31 : vector<1x128xf32>
    %33 = arith.mulf %27, %32 : vector<1x128xf32>
    %34 = arith.addf %19, %22 : vector<1x128xf32>
    %35 = arith.subf %34, %33 : vector<1x128xf32>
    %cst_3 = arith.constant 9.99999997E-7 : f32
    %36 = vector.broadcast %cst_3 : f32 to vector<1x128xf32>
    %37 = arith.maximumf %35, %36 : vector<1x128xf32>
    %38 = arith.divf %33, %37 : vector<1x128xf32>
    %cst_4 = arith.constant 9.99999997E-7 : f32
    %39 = vector.broadcast %cst_4 : f32 to vector<1x128xf32>
    %40 = arith.maximumf %38, %39 : vector<1x128xf32>
    %cst_5 = arith.constant 1.000000e+00 : f32
    %41 = vector.broadcast %cst_5 : f32 to vector<1x128xf32>
    %42 = arith.subf %41, %40 : vector<1x128xf32>
    %cst_6 = arith.constant dense<0.000000e+00> : vector<128xf32>
    %43 = vector.multi_reduction <add>, %42, %cst_6 [0] : vector<1x128xf32> to vector<128xf32>
    %44 = vector.shape_cast %43 : vector<128xf32> to vector<1x1x128xf32>
    %c0_7 = arith.constant 0 : index
    %c0_8 = arith.constant 0 : index
    %c0_9 = arith.constant 0 : index
    %45 = vector.load %arg2[%c0_7, %c0_8, %c0_9] : memref<1x1x128xf32, #tpu.memory_space<vmem>>, vector<1x1x128xf32>
    tpu.vector_store %arg2[%c0_7, %c0_8, %c0_9], %44 {strides = array<i32>} : memref<1x1x128xf32, #tpu.memory_space<vmem>>, vector<1x1x128xf32>,
    return
  }
  func.func @transform_0(%arg0: i32) -> (i32, i32, i32) {
    %c0_i32 = arith.constant 0 : i32
    %c0_i32_0 = arith.constant 0 : i32
    %c0_i32_1 = arith.constant 0 : i32
    return %c0_i32, %arg0, %c0_i32_0 : i32, i32, i32
  }
  func.func @transform_1(%arg0: i32) -> (i32, i32, i32) {
    %c0_i32 = arith.constant 0 : i32
    %c0_i32_0 = arith.constant 0 : i32
    %c0_i32_1 = arith.constant 0 : i32
    return %arg0, %c0_i32, %c0_i32_0 : i32, i32, i32
  }
}

</mosaic_0001>

<bundles_post_ra>
// kernel: tpu_custom_call.1
= control target key start
LH: loop header
LB: loop body
LE: loop exit
PB: predicated region body
PF: predicated region fallthrough
CT: control target
= control target key end

     0   :  { %6 = vsyncpa [#allocation3], 0  ;;  %s162_s0 = inlined_call_operand.hbm [shape: f32[8,1,128], index: 0, kind: input, shape index: {}]   ;;  %s163_s1 = inlined_call_operand.hbm [shape: f32[1,1,128], index: 1, kind: output, shape index: {}]  }
   0x1   :  { %7 = vsyncpa [#allocation4], 0  ;;  %s124_s6 = smov [#allocation2]   ;;  %s76_s10 = scalar_lea.hbm %s162_s0, 128 }
   0x2   :  { %s13_s7 = sshll.u32 %s124_s6, 4  ;;  %p77_p0 = scmp.ne.s32.totalorder %s162_s0, %s76_s10  ;;  %s14_s7 = int_to_ptr.vmem [resolvable:$true] %s13_s7 }
   0x3   :  { %p80_p1 = scmp.lt.u32.totalorder %s76_s10, %s162_s0 }
   0x5   :  { %p82_p2 = pnand %p80_p1, %p77_p0 }
   0x7   :  { %85 = shalt.err (!%p82_p2)
}
   0x8   :  { %s86_s15 = scalar_lea.vmem %s14_s7, 128  ;;  %p91_p4 = scmp.lt.s32.totalorder %s14_s7, %s14_s7 }
   0x9   :  { %p87_p3 = scmp.ne.s32.totalorder %s14_s7, %s86_s15  ;;  %p92_p5 = scmp.lt.s32.totalorder %s86_s15, %s86_s15 }
   0xb   :  { %p93_p6 = por %p92_p5, %p91_p4 }
   0xd   :  { %p94_p7 = pnand %p93_p6, %p87_p3 }
   0xf   :  { %97 = shalt.err (!%p94_p7)
}
  0x10   :  { %s125_s16 = smov 16   ;;  %s126_s17 = smov 1  }
  0x11   :  { %19 = dma.hbm_to_vmem [thread:$0]  %s162_s0, 128, %s14_s7, [#allocation3], %s125_s16, %s125_s16, %s126_s17  }
  0x12   :  { %120 = dma.done.wait [#allocation3], 128  }
  0x13   :  { %121 = vsyncadd [#allocation3], 4294967168  ;;  %v23_v0 = vld [vmem:[#allocation2] sm:$0x1]  ;;  %v24_v1 = vld [vmem:[#allocation2 + $0x1] sm:$0x1] }
  0x14   :  { %v25_v2 = vld [vmem:[#allocation2 + $0x2] sm:$0x1]  ;;  %v26_v3 = vld [vmem:[#allocation2 + $0x3] sm:$0x1]  ;;  %v27_v4 = vld [vmem:[#allocation2 + $0x4] sm:$0x1] }
  0x15   :  { %v28_v5 = vld [vmem:[#allocation2 + $0x5] sm:$0x1]  ;;  %v31_v6 = vsub.f32 %v25_v2, %v23_v0  ;;  %v29_v7 = vld [vmem:[#allocation2 + $0x6] sm:$0x1]  ;;  %v30_v8 = vld [vmem:[#allocation2 + $0x7] sm:$0x1]  ;;  %v32_v9 = vsub.f32 %v26_v3, %v24_v1  ;;  %v38_v10 = vmax.f32 %v23_v0, %v27_v4 }
  0x16   :  { %v42_v11 = vmax.f32 %v24_v1, %v28_v5  ;;  %v34_v12 = vsub.f32 %v29_v7, %v27_v4  ;;  %v35_v13 = vsub.f32 %v30_v8, %v28_v5  ;;  %v37_v14 = vmin.f32 %v25_v2, %v29_v7  ;;  %s127_s0 = smov [#allocation5]  }
  0x17   :  { %v41_v15 = vmin.f32 %v26_v3, %v30_v8  ;;  %v33_v16 = vmul.f32 %v32_v9, %v31_v6  ;;  %s61_s20 = sshll.u32 %s127_s0, 4  ;;  %s62_s20 = int_to_ptr.vmem [resolvable:$true] %s61_s20 }
  0x18   :  { %v36_v17 = vmul.f32 %v35_v13, %v34_v12  ;;  %v39_v18 = vsub.f32 %v37_v14, %v38_v10  ;;  %s98_s21 = scalar_lea.vmem %s62_s20, 16  ;;  %s102_s22 = scalar_lea.vmem %s62_s20, 32 }
  0x19   :  { %v43_v19 = vsub.f32 %v41_v15, %v42_v11  ;;  %p99_p8 = scmp.ne.s32.totalorder %s62_s20, %s98_s21  ;;  %p103_p9 = scmp.lt.s32.totalorder %s62_s20, %s62_s20 }
  0x1a   :  { %v40_v20 = vmax.f32 %v39_v18, 0.0  ;;  %v46_v22 = vadd.f32 %v36_v17, %v33_v16  ;;  %p104_p10 = scmp.lt.s32.totalorder %s102_s22, %s98_s21 }
  0x1b   :  { %v44_v21 = vmax.f32 %v43_v19, 0.0 }
  0x1c   :  { %p105_p11 = por %p104_p10, %p103_p9 }
  0x1d   :  { %v45_v23 = vmul.f32 %v44_v21, %v40_v20 }
  0x1e   :  { %p106_p12 = pnand %p105_p11, %p99_p8 }
  0x1f   :  { %v47_v24 = vsub.f32 %v46_v22, %v45_v23 }
  0x21   :  { %v48_v25 = vmax.f32 %v47_v24, 1e-06 }
  0x23   :  { %74 = vrcp.f32 %v48_v25 }
  0x2d   :  { %v75_v26 = vpop.eup %74 }
  0x2e   :  { %v50_v27 = vmul.f32 %v75_v26, %v45_v23 }
  0x30   :  { %v51_v28 = vmax.f32 %v50_v27, 1e-06 }
  0x32   :  { %v52_v29 = vsub.f32 1.0, %v51_v28 }
  0x34   :  { %54 = vst [vmem:[#allocation5] sm:$0x1] %v52_v29 }
  0x35   :  { %109 = shalt.err (!%p106_p12)
}
  0x36   :  { %s110_s25 = scalar_lea.hbm %s163_s1, 16 }
  0x37   :  { %p111_p13 = scmp.ne.s32.totalorder %s163_s1, %s110_s25  ;;  %p114_p0 = scmp.lt.u32.totalorder %s110_s25, %s163_s1 }
  0x39   :  { %p116_p1 = pnand %p114_p0, %p111_p13 }
  0x3b   :  { %119 = shalt.err (!%p116_p1)
}
  0x3c   :  { %64 = dma.vmem_to_hbm [thread:$0]  %s62_s20, 16, %s163_s1, [#allocation4]  }
  0x3d   :  { %122 = dma.done.wait [#allocation4], 16  }
  0x3e   :  { %123 = vsyncadd [#allocation4], 4294967280 }
  0x3f   :  { %68 = vsyncpa [#allocation3], 1 }
  0x40   :  { %69 = vsyncpa [#allocation4], 1 }

</bundles_post_ra>
